<compile_context>
chip_gen: v5e
topology: v5e:2x2
jax: 0.10.0
libtpu: 0.0.40
codegen_flags: <defaults>
</compile_context>

<pallas_src>
import functools
import math

import jax
import jax.numpy as jnp
import numpy as np
from jax.experimental import pallas as pl
from jax.experimental.pallas import tpu as pltpu

# Large finite negative additive bias.  exp(score + bias - max) underflows to
# exactly 0 for masked positions (matching the reference -inf fill) while
# avoiding the (-inf) - (-inf) = NaN hazard.  NOTE: fully-masked rows therefore
# return a plain softmax of the raw scores instead of the reference's NaNs.
_MASK_VALUE = -1e30
_TQ_CAP = 512                 # max query-row tile
_KPAD_MAX_OVERHEAD = 1.30     # max relative growth allowed for key-dim padding


def _round_up(x, m):
    return ((x + m - 1) // m) * m


@functools.lru_cache(maxsize=None)
def _tpu_params():
    """(vmem_limit_bytes, tile_budget_bytes, multi_core) for the local chip."""
    vmem_cap = 64 * 1024 * 1024        # v7x-safe default if the query fails
    multi_core = True                  # conservative default: keep >=2 bh groups
    try:
        vmem_cap = int(pltpu.get_tpu_info().vmem_capacity_bytes)
    except Exception:
        pass
    try:
        kind = jax.devices()[0].device_kind.lower()
        # Single-TensorCore chips (v5e / v6e): no benefit from reserving work
        # for a second core, so allow BHt == BH there.
        if "lite" in kind or "v5e" in kind or "v6e" in kind:
            multi_core = False
    except Exception:
        pass
    vmem_limit = min(int(0.75 * vmem_cap), 96 * 1024 * 1024)   # 48M v7x, 96M v5e/v6e
    vmem_limit = max(vmem_limit, 32 * 1024 * 1024)
    budget = int(0.80 * vmem_limit)
    return vmem_limit, budget, multi_core


# --------------------------------------------------------------------------- #
# Kernel
# --------------------------------------------------------------------------- #
def _build_kernel(bias_kind, hmask_kind, scale, tq, s_real, sk_pad):
    """Kernel for one (head-batch tile, query-row tile) grid cell.

    bias_kind / hmask_kind in {None, "block", "resident"}:
      "block":    ref is already the (1 or BHt, TQ, Sk) tile for this step.
      "resident": ref is the full (1, Sq_pad, Sk) grid-resident mask; the
                  kernel slices the current TQ query rows out of it.
    """
    kpad = sk_pad > s_real

    def kernel(*refs):
        i = 0
        q_ref = refs[i]; i += 1
        k_ref = refs[i]; i += 1
        v_ref = refs[i]; i += 1
        bias_ref = hmask_ref = None
        if bias_kind is not None:
            bias_ref = refs[i]; i += 1
        if hmask_kind is not None:
            hmask_ref = refs[i]; i += 1
        out_ref, attn_ref = refs[i], refs[i + 1]

        def q_rows(ref):
            # Current query-row tile of a grid-resident (1, Sq_pad, Sk) mask.
            row0 = pl.multiple_of(pl.program_id(1) * tq, 8)
            return ref[:, pl.ds(row0, tq), :]

        # Fold 1/sqrt(c) into q: TQ*C elementwise work instead of TQ*S.
        qs = q_ref[...] * scale

        # q @ k^T batched over the head tile, contracting the channel (last)
        # dim of both operands -> no materialized transpose of k.
        scores = jax.lax.dot_general(
            qs, k_ref[...],
            dimension_numbers=(((2,), (2,)), ((0,), (0,))),
            preferred_element_type=jnp.float32)

        if bias_kind == "resident":
            scores = scores + q_rows(bias_ref).astype(jnp.float32)
        elif bias_kind == "block":
            scores = scores + bias_ref[...].astype(jnp.float32)

        if kpad:
            # Mask the zero-padded key columns (compile-time-gated, no HBM cost).
            kidx = jax.lax.broadcasted_iota(jnp.int32, scores.shape, 2)
            scores = jnp.where(kidx < s_real, scores, _MASK_VALUE)

        # Numerically stable softmax over keys; normalization via EUP
        # reciprocal instead of an S^2-wide VPU divide.
        s_max = jnp.max(scores, axis=-1, keepdims=True)
        p = jnp.exp(scores - s_max)
        denom = jnp.sum(p, axis=-1, keepdims=True)
        attn = p * pl.reciprocal(denom, approx=False)

        attn = attn.astype(attn_ref.dtype)        # torch: attn_float.type_as(attn)
        # TODO(synk): attn_dropout > 0 (training mode) is not implemented; this
        # is the eval path (p = 0.0), matching the module default.
        if hmask_kind == "resident":
            attn = attn * q_rows(hmask_ref)
        elif hmask_kind == "block":
            attn = attn * hmask_ref[...]
        attn_ref[...] = attn                      # probs returned AFTER head_mask

        out = jax.lax.dot_general(
            attn.astype(v_ref.dtype), v_ref[...],
            dimension_numbers=(((2,), (1,)), ((0,), (0,))),
            preferred_element_type=jnp.float32)
        out_ref[...] = out.astype(out_ref.dtype)

    return kernel


# --------------------------------------------------------------------------- #
# Tile selection
# --------------------------------------------------------------------------- #
def _choose_tiles(BH, h, S, sk_pad, C, itemsize, mask_descs, budget, multi_core):
    """Pick (BHt, TQ, Sq_pad, resident_shared_masks).

    mask_descs: list of (layout, itemsize) with layout in
    {"shared", "batch", "head", "full"}.
    """

    def footprint(bht, tq, resident):
        sq_pad = ((S + tq - 1) // tq) * tq
        db = 2  # Pallas double-buffers every BlockSpec by default
        fp = db * bht * tq * C * itemsize * 2           # Q tile + out tile
        fp += db * bht * tq * sk_pad * itemsize         # attn-probs tile
        fp += db * 2 * bht * sk_pad * C * itemsize      # full-length K + V
        for layout, misz in mask_descs:
            if layout == "shared":
                fp += db * (sq_pad if resident else tq) * sk_pad * misz
            elif layout == "batch":
                fp += db * tq * sk_pad * misz
            else:                                       # "head" / "full"
                fp += db * bht * tq * sk_pad * misz
        # f32 scores / exp / attn temporaries (single-buffered compiler scratch).
        fp += 3 * bht * tq * sk_pad * 4
        return fp

    def search_tq(resident):
        tq = min(_TQ_CAP, _round_up(S, 8))
        while tq > 8 and footprint(1, tq, resident) > budget:
            tq = max(8, _round_up(tq // 2, 8))
        return tq

    resident = any(layout == "shared" for layout, _ in mask_descs)
    tq = search_tq(resident)
    if resident and footprint(1, tq, resident) > budget:
        resident = False                    # shared mask too big to keep resident
        tq = search_tq(False)
    # TODO(synk): if footprint(1, 8, False) still exceeds the budget (very long
    # sequences), a K-tiled online-softmax variant would be needed; the full
    # [S, S] attention-probability output makes such shapes impractical anyway.

    # Re-pick TQ to minimise query padding for the chosen tile count; prefer a
    # 128-multiple (MXU M dim / v5e) when that costs <= ~5% extra padded rows.
    nt = (S + tq - 1) // tq
    tq8 = _round_up((S + nt - 1) // nt, 8)
    tq128 = _round_up((S + nt - 1) // nt, 128)
    if (nt * tq128 <= max(int(1.05 * S), S + 8)
            and footprint(1, tq128, resident) <= budget):
        tq = tq128
    else:
        tq = tq8
    sq_pad = nt * tq

    # Batch heads per grid step to amortize grid overhead.  On multi-TC chips
    # keep >= 2 groups on the (parallel) bh axis so both cores get work.
    need_div_h = any(layout in ("batch", "head") for layout, _ in mask_descs)
    cap = BH if (not multi_core or BH == 1) else max(1, BH // 2)
    bht = 1
    for d in sorted((d for d in range(1, BH + 1) if BH % d == 0), reverse=True):
        if d > cap:
            continue
        if need_div_h and h % d != 0:
            continue
        if footprint(d, tq, resident) <= budget:
            bht = d
            break
    return bht, tq, sq_pad, resident


# --------------------------------------------------------------------------- #
# pallas_call wrapper on flattened [BH, S, C] tensors
# --------------------------------------------------------------------------- #
def _flat_self_attention(qf, kf, vf, bias, bias_layout, hmask, hmask_layout,
                         scale, h, S):
    BH, _, C = qf.shape
    vmem_limit, budget, multi_core = _tpu_params()

    # Key/value sequence padding to a lane-dense (multiple-of-128) width when
    # the relative overhead is small; padded columns are masked in-kernel and
    # stored as exact zeros, then sliced off in the wrapper.
    sk_pad = S
    if S >= 128 and S % 128 != 0:
        cand = _round_up(S, 128)
        if cand <= int(_KPAD_MAX_OVERHEAD * S):
            sk_pad = cand

    itemsize = jnp.dtype(qf.dtype).itemsize
    mask_descs = []
    if bias is not None:
        mask_descs.append((bias_layout, jnp.dtype(bias.dtype).itemsize))
    if hmask is not None:
        mask_descs.append((hmask_layout, jnp.dtype(hmask.dtype).itemsize))

    BHt, TQ, sq_pad, resident = _choose_tiles(
        BH, h, S, sk_pad, C, itemsize, mask_descs, budget, multi_core)

    # Zero-pad to the tiled shapes (padded query rows are finite garbage that
    # gets sliced off; padded key rows/cols are masked in the kernel).
    if sq_pad != S:
        qf = jnp.pad(qf, ((0, 0), (0, sq_pad - S), (0, 0)))
    if sk_pad != S:
        kf = jnp.pad(kf, ((0, 0), (0, sk_pad - S), (0, 0)))
        vf = jnp.pad(vf, ((0, 0), (0, sk_pad - S), (0, 0)))
    if sq_pad != S or sk_pad != S:
        if bias is not None:
            bias = jnp.pad(bias, ((0, 0), (0, sq_pad - S), (0, sk_pad - S)))
        if hmask is not None:
            hmask = jnp.pad(hmask, ((0, 0), (0, sq_pad - S), (0, sk_pad - S)))

    grid = (BH // BHt, sq_pad // TQ)
    io_map = lambda i, j: (i, j, 0)
    kv_map = lambda i, j: (i, 0, 0)       # K/V stay resident across the q-tile axis

    def mask_spec(layout):
        if layout == "shared":
            if resident:
                # Whole mask resident in VMEM for the entire grid (constant
                # block index => DMA'd once); kernel slices the q-tile rows.
                return (pl.BlockSpec((1, sq_pad, sk_pad), lambda i, j: (0, 0, 0)),
                        "resident")
            return pl.BlockSpec((1, TQ, sk_pad), lambda i, j: (0, j, 0)), "block"
        if layout == "batch":     # natural (b, S, S) mask; BHt | h guaranteed
            return (pl.BlockSpec((1, TQ, sk_pad),
                                 lambda i, j: ((i * BHt) // h, j, 0)), "block")
        if layout == "head":      # natural (h, S, S) mask; BHt | h guaranteed
            return (pl.BlockSpec((BHt, TQ, sk_pad),
                                 lambda i, j: (i % (h // BHt), j, 0)), "block")
        return pl.BlockSpec((BHt, TQ, sk_pad), io_map), "block"   # "full"

    in_specs = [
        pl.BlockSpec((BHt, TQ, C), io_map),        # Q tile
        pl.BlockSpec((BHt, sk_pad, C), kv_map),    # full-length K
        pl.BlockSpec((BHt, sk_pad, C), kv_map),    # full-length V
    ]
    args = [qf, kf, vf]
    bias_kind = hmask_kind = None
    if bias is not None:
        spec, bias_kind = mask_spec(bias_layout)
        in_specs.append(spec); args.append(bias)
    if hmask is not None:
        spec, hmask_kind = mask_spec(hmask_layout)
        in_specs.append(spec); args.append(hmask)

    kernel = _build_kernel(bias_kind, hmask_kind, scale, TQ, S, sk_pad)

    out, attn = pl.pallas_call(
        kernel,
        out_shape=(
            jax.ShapeDtypeStruct((BH, sq_pad, C), qf.dtype),
            jax.ShapeDtypeStruct((BH, sq_pad, sk_pad), qf.dtype),
        ),
        grid_spec=pltpu.PrefetchScalarGridSpec(
            num_scalar_prefetch=0,
            grid=grid,
            in_specs=in_specs,
            out_specs=[
                pl.BlockSpec((BHt, TQ, C), io_map),
                pl.BlockSpec((BHt, TQ, sk_pad), io_map),
            ],
        ),
        compiler_params=pltpu.CompilerParams(
            # bh axis "parallel": the 2-TC split (v7x / megacore) lands on whole
            # heads so K/V residency across the q-tile axis is preserved.
            dimension_semantics=("parallel", "arbitrary"),
            vmem_limit_bytes=vmem_limit,
        ),
    )(*args)
    return out, attn


# --------------------------------------------------------------------------- #
# Public API: matches SelfAttention.forward (eval mode, attn_dropout = 0)
# --------------------------------------------------------------------------- #
@jax.jit
def self_attention(q, k, v, attention_mask=None, head_mask=None):
    """Pallas equivalent of SelfAttention.forward (eval mode).

    q, k, v: [b, h, d1, ..., dn, c]
    attention_mask / head_mask: broadcastable to [b, h, S, S], S = prod(d1..dn);
      1 = attend, 0 = masked.
    Returns (out [b, h, d1, ..., dn, c], attn_probs [b, h, S, S]).
    """
    b, h, *spatial, c = q.shape
    S = int(np.prod(spatial)) if spatial else 1

    qf = q.reshape(b * h, S, c)
    kf = k.reshape(b * h, S, c)
    vf = v.reshape(b * h, S, c)

    def natural(m, dtype):
        """Keep the mask at its natural leading size (avoid materializing the
        full [b, h, S, S] broadcast).  Returns ((lead, S, S) array, layout)."""
        if m is None:
            return None, None
        m = jnp.asarray(m, dtype)
        while m.ndim < 4:
            m = m[None]
        if m.ndim > 4:                         # [b, h, d1, ..., q_dn, k_dn]
            m = m.reshape(m.shape[0], m.shape[1], -1, m.shape[-1])
        bm, hm = m.shape[0], m.shape[1]
        m = jnp.broadcast_to(m, (bm, hm, S, S))
        if bm == 1 and hm == 1:
            return m.reshape(1, S, S), "shared"
        if hm == 1:
            return jnp.broadcast_to(m, (b, 1, S, S)).reshape(b, S, S), "batch"
        if bm == 1:
            return jnp.broadcast_to(m, (1, h, S, S)).reshape(h, S, S), "head"
        return jnp.broadcast_to(m, (b, h, S, S)).reshape(b * h, S, S), "full"

    amask, a_layout = natural(attention_mask, jnp.float32)
    if amask is not None:
        # Additive bias in bf16 (half the HBM bytes of an f32 bias; 0 and -1e30
        # are exactly representable).  exp underflows to exactly 0 for masked
        # positions, matching the reference -inf fill for non-degenerate rows.
        bias = jnp.where(amask == 0, jnp.float32(_MASK_VALUE),
                         jnp.float32(0.0)).astype(jnp.bfloat16)
    else:
        bias, a_layout = None, None
    hmask, h_layout = natural(head_mask, q.dtype)

    scale = 1.0 / math.sqrt(c)
    out_f, attn_f = _flat_self_attention(qf, kf, vf, bias, a_layout,
                                         hmask, h_layout, scale, h, S)

    out = out_f[:, :S, :].reshape(b, h, *spatial, c)
    attn_probs = attn_f[:, :S, :S].reshape(b, h, S, S)
    return out, attn_probs


# --------------------------------------------------------------------------- #
# Pure-JAX reference mirroring the PyTorch code (for validation)
# --------------------------------------------------------------------------- #
def _reference_attention(q, k, v, attention_mask=None, head_mask=None):
    b, h, *spatial, c = q.shape
    S = int(np.prod(spatial)) if spatial else 1
    qf = q.reshape(b, h, S, c)
    kf = k.reshape(b, h, S, c)
    vf = v.reshape(b, h, S, c)
    attn = jnp.einsum('bhqc,bhkc->bhqk', qf, kf) / jnp.sqrt(jnp.float32(c))
    if attention_mask is not None:
        attn = jnp.where(attention_mask == 0, -jnp.inf, attn)
    attn = jax.nn.softmax(attn, axis=-1)
    if head_mask is not None:
        attn = attn * head_mask          # PyTorch returns attn AFTER head_mask
    out = jnp.einsum('bhqk,bhkc->bhqc', attn, vf)
    return out.reshape(b, h, *spatial, c), attn


if __name__ == "__main__":
    key = jax.random.PRNGKey(0)
    keys = jax.random.split(key, 12)

    def check(got, want):
        np.testing.assert_allclose(np.asarray(got), np.asarray(want),
                                   rtol=1e-4, atol=1e-5)

    # Small shapes: b=2, h=2, 4x4 spatial grid (-> seq=16), c=32.
    b, h, d1, d2, c = 2, 2, 4, 4, 32
    S = d1 * d2
    q = jax.random.normal(keys[0], (b, h, d1, d2, c), dtype=jnp.float32)
    k = jax.random.normal(keys[1], (b, h, d1, d2, c), dtype=jnp.float32)
    v = jax.random.normal(keys[2], (b, h, d1, d2, c), dtype=jnp.float32)

    # Case 1: full per-(batch, head) masks.  Keep the diagonal attendable so no
    # row is fully masked (fully masked rows are NaN in the PyTorch reference).
    amask = (jax.random.uniform(keys[3], (b, h, S, S)) > 0.3).astype(jnp.float32)
    amask = jnp.maximum(amask, jnp.eye(S, dtype=jnp.float32)[None, None])
    hmask = (jax.random.uniform(keys[4], (b, h, S, S)) > 0.2).astype(jnp.float32)
    out1, attn1 = self_attention(q, k, v, attention_mask=amask, head_mask=hmask)
    jax.block_until_ready((out1, attn1))
    ref_o, ref_a = _reference_attention(q, k, v, attention_mask=amask,
                                        head_mask=hmask)
    check(out1, ref_o); check(attn1, ref_a)
    assert out1.shape == (b, h, d1, d2, c)
    assert attn1.shape == (b, h, S, S)

    # Case 2: no masks (no mask DMA, no masking arithmetic in the kernel).
    out2, attn2 = self_attention(q, k, v)
    jax.block_until_ready((out2, attn2))
    ref_o, ref_a = _reference_attention(q, k, v)
    check(out2, ref_o); check(attn2, ref_a)

    # Case 3: shared attention mask (kept VMEM-resident) + per-batch head mask
    # (kept at its natural (b, S, S) size, no b*h materialization).
    amask_s = (jax.random.uniform(keys[5], (1, 1, S, S)) > 0.3).astype(jnp.float32)
    amask_s = jnp.maximum(amask_s, jnp.eye(S, dtype=jnp.float32)[None, None])
    hmask_b = (jax.random.uniform(keys[6], (b, 1, S, S)) > 0.2).astype(jnp.float32)
    out3, attn3 = self_attention(q, k, v, attention_mask=amask_s,
                                 head_mask=hmask_b)
    jax.block_until_ready((out3, attn3))
    ref_o, ref_a = _reference_attention(q, k, v, attention_mask=amask_s,
                                        head_mask=hmask_b)
    check(out3, ref_o); check(attn3, ref_a)

    # Case 4: non-128-multiple sequence (24x24 spatial -> S=576) exercising the
    # key-dim lane padding + in-kernel padded-column masking + resident shared
    # mask with multiple query tiles.
    b4, h4, d4, c4 = 1, 2, 24, 32
    S4 = d4 * d4
    q4 = jax.random.normal(keys[7], (b4, h4, d4, d4, c4), dtype=jnp.float32)
    k4 = jax.random.normal(keys[8], (b4, h4, d4, d4, c4), dtype=jnp.float32)
    v4 = jax.random.normal(keys[9], (b4, h4, d4, d4, c4), dtype=jnp.float32)
    amask4 = (jax.random.uniform(keys[10], (1, 1, S4, S4)) > 0.3).astype(jnp.float32)
    amask4 = jnp.maximum(amask4, jnp.eye(S4, dtype=jnp.float32)[None, None])
    out4, attn4 = self_attention(q4, k4, v4, attention_mask=amask4)
    jax.block_until_ready((out4, attn4))
    ref_o, ref_a = _reference_attention(q4, k4, v4, attention_mask=amask4)
    check(out4, ref_o); check(attn4, ref_a)
    assert out4.shape == (b4, h4, d4, d4, c4)
    assert attn4.shape == (b4, h4, S4, S4)

    print("KERNEL_OK")
</pallas_src>

<mosaic_0001>
module attributes {stable_mosaic.version = 11 : i64} {
  func.func @kernel(%arg0: i32, %arg1: i32, %arg2: memref<2x16x32xf32, #tpu.memory_space<vmem>>, %arg3: memref<2x16x32xf32, #tpu.memory_space<vmem>>, %arg4: memref<2x16x32xf32, #tpu.memory_space<vmem>>, %arg5: memref<2x16x16xbf16, #tpu.memory_space<vmem>>, %arg6: memref<2x16x16xf32, #tpu.memory_space<vmem>>, %arg7: memref<2x16x32xf32, #tpu.memory_space<vmem>>, %arg8: memref<2x16x16xf32, #tpu.memory_space<vmem>>) attributes {dimension_semantics = [#tpu.dimension_semantics<parallel>, #tpu.dimension_semantics<arbitrary>], iteration_bounds = array<i64: 2, 1>, scalar_prefetch = 0 : i64, scratch_operands = 0 : i64, tpu.core_type = #tpu.core_type<tc>, window_params = [{transform_indices = @transform_0, window_bounds = array<i64: 2, 16, 32>}, {transform_indices = @transform_1, window_bounds = array<i64: 2, 16, 32>}, {transform_indices = @transform_2, window_bounds = array<i64: 2, 16, 32>}, {transform_indices = @transform_3, window_bounds = array<i64: 2, 16, 16>}, {transform_indices = @transform_4, window_bounds = array<i64: 2, 16, 16>}, {transform_indices = @transform_5, window_bounds = array<i64: 2, 16, 32>}, {transform_indices = @transform_6, window_bounds = array<i64: 2, 16, 16>}]} {
    %c0 = arith.constant 0 : index
    %c0_0 = arith.constant 0 : index
    %c0_1 = arith.constant 0 : index
    %0 = vector.load %arg2[%c0, %c0_0, %c0_1] : memref<2x16x32xf32, #tpu.memory_space<vmem>>, vector<2x16x32xf32>
    %cst = arith.constant 0.176776692 : f32
    %1 = vector.broadcast %cst : f32 to vector<2x16x32xf32>
    %2 = arith.mulf %0, %1 : vector<2x16x32xf32>
    %c0_2 = arith.constant 0 : index
    %c0_3 = arith.constant 0 : index
    %c0_4 = arith.constant 0 : index
    %3 = vector.load %arg3[%c0_2, %c0_3, %c0_4] : memref<2x16x32xf32, #tpu.memory_space<vmem>>, vector<2x16x32xf32>
    %cst_5 = arith.constant dense<0.000000e+00> : vector<2x16x16xf32>
    %4 = tpu.matmul %2, %3, %cst_5 {dimension_numbers = #tpu.dot_dimension_numbers<[2], [2], [1], [1], [0, 0, 0, 1, 1, 1], [0], [0]>} : vector<2x16x32xf32>, vector<2x16x32xf32>, vector<2x16x16xf32> -> vector<2x16x16xf32>
    %c0_6 = arith.constant 0 : index
    %c0_7 = arith.constant 0 : index
    %c0_8 = arith.constant 0 : index
    %5 = vector.load %arg5[%c0_6, %c0_7, %c0_8] : memref<2x16x16xbf16, #tpu.memory_space<vmem>>, vector<2x16x16xbf16>
    %6 = arith.extf %5 : vector<2x16x16xbf16> to vector<2x16x16xf32>
    %7 = arith.addf %4, %6 : vector<2x16x16xf32>
    %cst_9 = arith.constant dense<0xFF800000> : vector<2x16xf32>
    %8 = vector.multi_reduction <maximumf>, %7, %cst_9 [2] : vector<2x16x16xf32> to vector<2x16xf32>
    %9 = vector.shape_cast %8 : vector<2x16xf32> to vector<2x16x1xf32>
    %10 = vector.broadcast %9 : vector<2x16x1xf32> to vector<2x16x16xf32>
    %11 = arith.subf %7, %10 : vector<2x16x16xf32>
    %12 = math.exp %11 : vector<2x16x16xf32>
    %cst_10 = arith.constant dense<0.000000e+00> : vector<2x16xf32>
    %13 = vector.multi_reduction <add>, %12, %cst_10 [2] : vector<2x16x16xf32> to vector<2x16xf32>
    %14 = vector.shape_cast %13 : vector<2x16xf32> to vector<2x16x1xf32>
    %15 = tpu.reciprocal %14 : vector<2x16x1xf32> -> vector<2x16x1xf32>
    %16 = vector.broadcast %15 : vector<2x16x1xf32> to vector<2x16x16xf32>
    %17 = arith.mulf %12, %16 : vector<2x16x16xf32>
    %c0_11 = arith.constant 0 : index
    %c0_12 = arith.constant 0 : index
    %c0_13 = arith.constant 0 : index
    %18 = vector.load %arg6[%c0_11, %c0_12, %c0_13] : memref<2x16x16xf32, #tpu.memory_space<vmem>>, vector<2x16x16xf32>
    %19 = arith.mulf %17, %18 : vector<2x16x16xf32>
    %c0_14 = arith.constant 0 : index
    %c0_15 = arith.constant 0 : index
    %c0_16 = arith.constant 0 : index
    %20 = vector.load %arg8[%c0_14, %c0_15, %c0_16] : memref<2x16x16xf32, #tpu.memory_space<vmem>>, vector<2x16x16xf32>
    tpu.vector_store %arg8[%c0_14, %c0_15, %c0_16], %19 {strides = array<i32>} : memref<2x16x16xf32, #tpu.memory_space<vmem>>, vector<2x16x16xf32>,
    %c0_17 = arith.constant 0 : index
    %c0_18 = arith.constant 0 : index
    %c0_19 = arith.constant 0 : index
    %21 = vector.load %arg4[%c0_17, %c0_18, %c0_19] : memref<2x16x32xf32, #tpu.memory_space<vmem>>, vector<2x16x32xf32>
    %cst_20 = arith.constant dense<0.000000e+00> : vector<2x16x32xf32>
    %22 = tpu.matmul %19, %21, %cst_20 {dimension_numbers = #tpu.dot_dimension_numbers<[2], [1], [1], [2], [0, 0, 0, 1, 1, 2], [0], [0]>} : vector<2x16x16xf32>, vector<2x16x32xf32>, vector<2x16x32xf32> -> vector<2x16x32xf32>
    %c0_21 = arith.constant 0 : index
    %c0_22 = arith.constant 0 : index
    %c0_23 = arith.constant 0 : index
    %23 = vector.load %arg7[%c0_21, %c0_22, %c0_23] : memref<2x16x32xf32, #tpu.memory_space<vmem>>, vector<2x16x32xf32>
    tpu.vector_store %arg7[%c0_21, %c0_22, %c0_23], %22 {strides = array<i32>} : memref<2x16x32xf32, #tpu.memory_space<vmem>>, vector<2x16x32xf32>,
    return
  }
  func.func @transform_0(%arg0: i32, %arg1: i32) -> (i32, i32, i32) {
    %c0_i32 = arith.constant 0 : i32
    %c0_i32_0 = arith.constant 0 : i32
    return %arg0, %arg1, %c0_i32 : i32, i32, i32
  }
  func.func @transform_1(%arg0: i32, %arg1: i32) -> (i32, i32, i32) {
    %c0_i32 = arith.constant 0 : i32
    %c0_i32_0 = arith.constant 0 : i32
    %c0_i32_1 = arith.constant 0 : i32
    return %arg0, %c0_i32, %c0_i32_0 : i32, i32, i32
  }
  func.func @transform_2(%arg0: i32, %arg1: i32) -> (i32, i32, i32) {
    %c0_i32 = arith.constant 0 : i32
    %c0_i32_0 = arith.constant 0 : i32
    %c0_i32_1 = arith.constant 0 : i32
    return %arg0, %c0_i32, %c0_i32_0 : i32, i32, i32
  }
  func.func @transform_3(%arg0: i32, %arg1: i32) -> (i32, i32, i32) {
    %c0_i32 = arith.constant 0 : i32
    %c0_i32_0 = arith.constant 0 : i32
    return %arg0, %arg1, %c0_i32 : i32, i32, i32
  }
  func.func @transform_4(%arg0: i32, %arg1: i32) -> (i32, i32, i32) {
    %c0_i32 = arith.constant 0 : i32
    %c0_i32_0 = arith.constant 0 : i32
    return %arg0, %arg1, %c0_i32 : i32, i32, i32
  }
  func.func @transform_5(%arg0: i32, %arg1: i32) -> (i32, i32, i32) {
    %c0_i32 = arith.constant 0 : i32
    %c0_i32_0 = arith.constant 0 : i32
    return %arg0, %arg1, %c0_i32 : i32, i32, i32
  }
  func.func @transform_6(%arg0: i32, %arg1: i32) -> (i32, i32, i32) {
    %c0_i32 = arith.constant 0 : i32
    %c0_i32_0 = arith.constant 0 : i32
    return %arg0, %arg1, %c0_i32 : i32, i32, i32
  }
}

</mosaic_0001>

<bundles_post_ra>
// kernel: self_attention.1
= control target key start
LH: loop header
LB: loop body
LE: loop exit
PB: predicated region body
PF: predicated region fallthrough
CT: control target
= control target key end

     0   :  { %s1656_s0 = inlined_call_operand.vmem [shape: f32[4,16,32], index: 0, kind: input, shape index: {}]   ;;  %s1657_s1 = inlined_call_operand.hbm [shape: f32[4,16,32], index: 1, kind: input, shape index: {}]   ;;  %s1658_s2 = inlined_call_operand.hbm [shape: f32[4,16,32], index: 2, kind: input, shape index: {}]   ;;  %s1659_s3 = inlined_call_operand.vmem [shape: bf16[4,16,16], index: 3, kind: input, shape index: {}]   ;;  %s1660_s4 = inlined_call_operand.hbm [shape: f32[4,16,16], index: 4, kind: input, shape index: {}]   ;;  %s1661_s5 = inlined_call_operand.hbm [shape: f32[4,16,32], index: 5, kind: output, shape index: {0}]   ;;  %s1662_s6 = inlined_call_operand.hbm [shape: f32[4,16,16], index: 6, kind: output, shape index: {1}]  }
   0x1   :  { %1671 = sst [smem:[#allocation22_spill]] %s1658_s2 }
   0x2   :  { %1672 = sst [smem:[#allocation23_spill]] %s1661_s5 }
   0x3   :  { %12 = vsyncpa [#allocation3], 0 }
   0x4   :  { %14 = vsyncpa [#allocation3 + $0x1], 0 }
   0x5   :  { %15 = vsyncpa [#allocation6], 0 }
   0x6   :  { %17 = vsyncpa [#allocation6 + $0x1], 0 }
   0x7   :  { %18 = vsyncpa [#allocation4], 0 }
   0x8   :  { %20 = vsyncpa [#allocation4 + $0x1], 0 }
   0x9   :  { %21 = vsyncpa [#allocation10], 0 }
   0xa   :  { %23 = vsyncpa [#allocation10 + $0x1], 0  ;;  %s1406_s21 = smov 0   ;;  %s1408_s22 = smov 0  }
   0xb   :  { %s1410_s23 = smov 0   ;;  %s1412_s24 = smov 0  }
   0xc   :  { %s1414_s25 = smov 0   ;;  %s1416_s26 = smov 0  }
   0xd LB: > { %1673 = sst [smem:[#allocation15_spill]] %s1345_s21  ;;  %s1437_s27 = sadd.s32 4294967295, %s1365_s26   ;;  %s1365_s26 = sphi %s1416_s26, %s29_s26   ;;  %s1361_s25 = sphi %s1414_s25, %s1694_s25   ;;  %s1357_s24 = sphi %s1412_s24, %s1693_s24   ;;  %s1353_s23 = sphi %s1410_s23, %s1692_s23   ;;  %s1349_s22 = sphi %s1408_s22, %s1696_s22   ;;  %s1345_s21 = sphi %s1406_s21, %s1695_s21  }
   0xe   : > { %1674 = sst [smem:[#allocation16_spill]] %s1353_s23  ;;  %s990_s28 = sadd.s32 4294967294, %s1365_s26  }
   0xf   : > { %1675 = sst [smem:[#allocation17_spill]] %s1361_s25  ;;  %s41_s29 = sadd.s32 1, %s1361_s25 }
  0x10   : > { %1676 = sst [smem:[#allocation18_spill]] %s1365_s26  ;;  %s76_s30 = sadd.s32 1, %s1353_s23 }
  0x11   : > { %p43_p0 = scmp.ge.s32.totalorder %s41_s29, 2  ;;  %p83_p1 = scmp.ne.s32.totalorder %s1353_s23, %s1349_s22 }
  0x12   : > { %p84_p2 = scmp.eq.s32.totalorder %s1365_s26, 0  ;;  %p89_p3 = scmp.ne.s32.totalorder %s1349_s22, %s1345_s21 }
  0x13   : > { %s1698_s29 = smov (%p43_p0, %s41_s29), 0  ;;  %p90_p5 = scmp.eq.s32.totalorder %s1437_s27, 0 }
  0x14   : > { %1677 = sst [smem:[#allocation19_spill]] %s1698_s29  ;;  %p1449_p4 = por %p84_p2, %p83_p1 }
  0x15   : > { %s73_s8 = ssub.s32 %s1361_s25, %s1698_s29  ;;  %p197_p6 = scmp.eq.s32.totalorder %s1437_s27, 1 }
  0x16   : > { %p74_p7 = scmp.eq.s32.totalorder %s73_s8, 0  ;;  %p1457_p8 = por %p90_p5, %p89_p3 }
  0x17   : > { %p1461_p9 = por %p197_p6, %p83_p1  ;;  %p203_p10 = scmp.eq.s32.totalorder %s990_s28, 1 }
  0x18   : > { %s1466_s11 = scalar_select %p74_p7, %s1353_s23, %s76_s30  }
  0x19   : > { %p1468_p11 = por %p203_p10, %p89_p3  ;;  %p992_p12 = scmp.ge.s32.totalorder %s1365_s26, 2 }
  0x1a   : > { %1681 = sst [smem:[#allocation20_spill]] %s1466_s11  ;;  %p1087_p13 = scmp.lt.s32.totalorder %s1365_s26, 2 }
  0x1b   : > { %s1682_s12 = scalar_select %p1468_p11, 1, 0 }
  0x1c   : > { %s266_s13 = sand.u32 1, %s1353_s23   ;;  %s1040_s15 = sshll.u32 %s1361_s25, 5 }
  0x1d   : > { %1683 = sst [smem:[#allocation21_spill]] %s1682_s12  ;;  %s1475_s14 = sshll.u32 %s266_s13, 5 }
  0x1e   : > { %p1480_p0 = pnand %p1087_p13, %p1449_p4  ;;  %s289_s17 = sand.u32 1, %s1365_s26  }
  0x1f   : > { %s1685_s2 = sld [smem:[#allocation22_spill]]  ;;  %s293_s30 = scalar_lea.vmem [#allocation5], %s1475_s14 }
  0x20   : > { %s302_s8 = sshll.u32 %s293_s30, 4  ;;  %s290_s29 = scalar_lea.sflag [#allocation6], %s289_s17  ;;  %s303_s8 = int_to_ptr.vmem [resolvable:$true] %s302_s8 }
  0x21   : > { %s1367_s25 = smov 128   ;;  %s1368_s7 = smov 8  }
  0x22   : > { %p1005_p1 = scmp.ge.s32.totalorder %s1365_s26, 1  ;;  %p350_p2 = scmp.lt.s32.totalorder %s1365_s26, 3 }
  0x23   : > { %s267_s17 = scalar_lea.sflag [#allocation3], %s266_s13  ;;  %s339_s26 = scalar_lea.hbm %s1660_s4, %s1040_s15 }
  0x24   : > { %p1493_p3 = pnand %p1005_p1, %p350_p2  ;;  %s340_s12 = sshll.u32 %s339_s26, 4  ;;  %s341_s12 = int_to_ptr.hbm [resolvable:$true] %s340_s12 }
  0x25   : > { %s299_s20 = scalar_lea.hbm %s1685_s2, %s1040_s15  ;;  %s270_s2 = scalar_lea.vmem [#allocation2], %s1475_s14 }
  0x26   : > { %s300_s28 = sshll.u32 %s299_s20, 4  ;;  %s276_s20 = scalar_lea.hbm %s1657_s1, %s1040_s15  ;;  %s301_s28 = int_to_ptr.hbm [resolvable:$true] %s300_s28 }
  0x27   : > { %1076 = dma.hbm_to_vmem [thread:$0]  (!%p1480_p0), %s301_s28, 512, %s303_s8, %s290_s29, %s1367_s25, %s1367_s25, %s1368_s7  }
  0x28   : > { %s277_s30 = sshll.u32 %s276_s20, 4  ;;  %s279_s23 = sshll.u32 %s270_s2, 4  ;;  %s278_s30 = int_to_ptr.hbm [resolvable:$true] %s277_s30  ;;  %s280_s23 = int_to_ptr.vmem [resolvable:$true] %s279_s23 }
  0x29   : > { %1073 = dma.hbm_to_vmem [thread:$0]  (!%p1480_p0), %s278_s30, 512, %s280_s23, %s267_s17, %s1367_s25, %s1367_s25, %s1368_s7  }
  0x2a   : > { %s331_s21 = scalar_lea.vmem [#allocation7], %s1475_s14  ;;  %354 = sbr.rel (%p1493_p3) target bundleno = 606 (0x25e), region = 40 }
  0x2b   : > { %s342_s5 = sshll.u32 %s331_s21, 4  ;;  %s1512_s2 = sand.u32 (!%p1493_p3), 1, %s1349_s22   ;;  %s343_s5 = int_to_ptr.vmem [resolvable:$true] %s342_s5 }
  0x2c   : > { %1079 = dma.hbm_to_vmem [thread:$0]  (!%p1480_p0), %s341_s12, 512, %s343_s5, %s290_s29, %s1367_s25, %s1367_s25, %s1368_s7  }
  0x2d   : > { %s1515_s23 = sshll.u32 (!%p1493_p3), %s1512_s2, 5  ;;  %s357_s13 = scalar_lea.sflag (!%p1493_p3), [#allocation3], %s1512_s2 }
  0x2e   : > { %s360_s26 = scalar_lea.vmem (!%p1493_p3), [#allocation2], %s1515_s23 }
  0x2f   : > { %1328 = dma.done.wait (%p1457_p8), %s357_s13, 512  }
  0x30   : > { %1330 = vsyncadd (%p1457_p8), %s357_s13, 4294966784  ;;  %s366_s5 = sand.u32 1, %s1437_s27   ;;  %s1525_s25 = scalar_lea.vmem [#allocation5], %s1515_s23 }
  0x31   : > { %s367_s21 = scalar_lea.sflag [#allocation6], %s366_s5 }
  0x32   : > { %1332 = dma.done.wait (%p1457_p8), %s367_s21, 1024  }
  0x33   : > { %1334 = vsyncadd (%p1457_p8), %s367_s21, 4294966272  ;;  %s1011_s29 = sshll.u32 %s1357_s24, 1  ;;  %vm497_vm0 = vcmask 261120   ;;  %v486_v0 = vld [vmem:[%s360_s26 + $0x8] sm:$0xff]  ;;  %v488_v2 = vld [vmem:[%s360_s26 + $0x18] sm:$0xff]  ;;  %vm568_vm1 = vcmask 130048  }
  0x34   : > { %p447_p4 = scmp.lt.s32.totalorder %s1011_s29, 3  ;;  %1017 = vmatpush.xpose.msk.msra.mxu0 %vm497_vm0, %v486_v0  ;;  %v485_v3 = vld [vmem:[%s360_s26] sm:$0xff]  ;;  %1021 = vmatpush.xpose.msk.msra.mxu1 %vm497_vm0, %v488_v2  ;;  %v487_v5 = vld [vmem:[%s360_s26 + $0x10] sm:$0xff]  ;;  %v678_v50 = vld [vmem:[%s1525_s25 + $0x8] sm:$0xff]  ;;  %s1568_s18 = scalar_lea.vmem [#allocation7], %s1515_s23 }
  0x35   : > { %701 = vmatpush.msra.mxu2 %v678_v50  ;;  %v677_v51 = vld [vmem:[%s1525_s25] sm:$0xff]  ;;  %v680_v52 = vld [vmem:[%s1525_s25 + $0x18] sm:$0xff]  ;;  %v679_v53 = vld [vmem:[%s1525_s25 + $0x10] sm:$0xff]  ;;  %s1572_s19 = scalar_lea.vmem [#allocation9], %s1515_s23  ;;  %s1048_s20 = sshll.u32 %s1357_s24, 5 }
  0x36   : > { %s1700_s29 = smov (!%p447_p4, %s1011_s29), 3  ;;  %730 = vmatpush.msra.mxu3 %v680_v52  ;;  %s784_s30 = sshll.u32 %s1572_s19, 4  ;;  %s785_s30 = int_to_ptr.vmem [resolvable:$true] %s784_s30 }
  0x37   : > { %s1045_s11 = sshll.u32 %s1700_s29, 4  ;;  %s1046_s27 = sshll.u32 %s1700_s29, 3  ;;  %702 = vmatpush.msra.mxu2 %v677_v51 }
  0x38   : > { %s454_s15 = scalar_lea.vmem %s1656_s0, %s1045_s11  ;;  %1018 = vmatpush.xpose.msk.msra.mxu0 %vm497_vm0, %v485_v3  ;;  %1022 = vmatpush.xpose.msk.msra.mxu1 %vm497_vm0, %v487_v5  ;;  %s468_s7 = scalar_lea.vmem %s1659_s3, %s1046_s27 }
  0x39   : > { %v477_v1 = vld [vmem:[%s454_s15] sm:$0xff]  ;;  %v479_v4 = vld [vmem:[%s454_s15 + $0x10] sm:$0xff]  ;;  %v478_v8 = vld [vmem:[%s454_s15 + $0x8] sm:$0xff]  ;;  %731 = vmatpush.msra.mxu3 %v679_v53  ;;  %s783_s8 = scalar_lea.hbm %s1662_s6, %s1048_s20  ;;  %s749_s26 = scalar_lea.sflag [#allocation10], %s1512_s2 }
  0x3a   : > { %v481_v6 = vmul.f32 0.17677669, %v477_v1  ;;  %v483_v7 = vmul.f32 0.17677669, %v479_v4  ;;  %v480_v9 = vld [vmem:[%s454_s15 + $0x18] sm:$0xff]  ;;  %v1052_v12 = vld [vmem:[%s468_s7] sm:$0xff]  }
  0x3b   : > { %v482_v10 = vmul.f32 0.17677669, %v478_v8  ;;  %v484_v11 = vmul.f32 0.17677669, %v480_v9  ;;  %v1053_v13 = vunpack.c.l.bf16 %v1052_v12  ;;  %v1059_v14 = vld [vmem:[%s468_s7 + $0x8] sm:$0xff]   ;;  %v1054_v20 = vunpack.c.h.bf16 %v1052_v12  ;;  %v665_v9 = vld [vmem:[%s1568_s18] sm:$0xff] }
  0x3c   : > { %1019 = vmatmul.msk.f32.vlgmr.msra.gmra.mxu0 %vm497_vm0, %v481_v6  ;;  %1023 = vmatmul.msk.f32.vlgmr.msra.gmra.mxu1 %vm497_vm0, %v483_v7  ;;  %v1057_v17 = vunpack.c.l.bf16 %v1059_v14  ;;  %v1058_v25 = vunpack.c.h.bf16 %v1059_v14  ;;  %s786_s13 = sshll.u32 %s783_s8, 4  ;;  %s1267_s24 = scalar_lea.hbm %s1662_s6, 64  ;;  %s787_s13 = int_to_ptr.hbm [resolvable:$true] %s786_s13 }
  0x3d   : > { %s1261_s5 = sshra.s32 %s787_s13, 4  ;;  %s1262_s5 = int_to_ptr.hbm [resolvable:$true] %s1261_s5 }
  0x3e   : > { %s1263_s21 = scalar_lea.hbm %s1262_s5, 32  ;;  %p1268_p8 = scmp.lt.s32.totalorder %s1262_s5, %s1662_s6 }
  0x3f   : > { %p1264_p5 = scmp.ne.s32.totalorder %s1262_s5, %s1263_s21  ;;  %p1269_p10 = scmp.lt.s32.totalorder %s1267_s24, %s1263_s21 }
  0x41   : > { %p1265_p6 = pnand %p1264_p5, %p1461_p9  ;;  %p1270_p13 = por %p1269_p10, %p1268_p8 }
  0x43   : > { %p1266_p7 = pneg %p1265_p6 }
  0x44   : > { %1020 = vmatmul.msk.f32.gmra.mxu0 %vm497_vm0, %v482_v10  ;;  %1024 = vmatmul.msk.f32.gmra.mxu1 %vm497_vm0, %v484_v11 }
  0x45   : > { %p1271_p0 = pnand %p1270_p13, %p1266_p7 }
  0xb9   : > { %v527_v15 = vpop.f32.mrf.mxu0  ;;  %v562_v18 = vpop.f32.mrf.mxu1 }
  0xba   : > { %v528_v16 = vadd.f32 %v1053_v13, %v527_v15  ;;  %v563_v21 = vadd.f32 %v1057_v17, %v562_v18 }
  0xbc   : > { %v569_v19 = vsel %vm568_vm1, %v528_v16, -inf  ;;  %v575_v24 = vsel %vm568_vm1, %v563_v21, -inf }
  0xbd   : > { %570 = vmax.xlane.f32.xlu0 %v569_v19 }
  0xc1   : > { %v530_v22 = vpop.f32.mrf.mxu0  ;;  %v565_v26 = vpop.f32.mrf.mxu1 }
  0xc2   : > { %v531_v23 = vadd.f32 %v1054_v20, %v530_v22  ;;  %v566_v28 = vadd.f32 %v1058_v25, %v565_v26 }
  0xc4   : > { %v572_v27 = vsel %vm568_vm1, %v531_v23, -inf  ;;  %v578_v29 = vsel %vm568_vm1, %v566_v28, -inf }
  0xc5   : > { %573 = vmax.xlane.f32.xlu1 %v572_v27  ;;  %576 = vmax.xlane.f32.xlu0 %v575_v24 }
  0xcd   : > { %579 = vmax.xlane.f32.xlu1 %v578_v29 }
 0x130   : > { %v571_v30 = vpop.xlane.xlu0 %570 }
 0x131   : > { %v581_v31 = vsub.f32 %v528_v16, %v571_v30 }
 0x133   : > { %v585_v32 = vmul.f32 1.442695, %v581_v31 }
 0x135   : > { %1141 = vpow2.f32 %v585_v32  ;;  %v667_v32 = vld [vmem:[%s1568_s18 + $0x10] sm:$0xff] }
 0x138   : > { %v574_v33 = vpop.xlane.xlu1 %573  ;;  %v577_v34 = vpop.xlane.xlu0 %576 }
 0x139   : > { %v582_v35 = vsub.f32 %v531_v23, %v574_v33  ;;  %v583_v36 = vsub.f32 %v563_v21, %v577_v34 }
 0x13b   : > { %v1142_v37 = vpop.eup %1141  ;;  %v587_v38 = vmul.f32 1.442695, %v582_v35  ;;  %v589_v39 = vmul.f32 1.442695, %v583_v36 }
 0x13c   : > { %v593_v40 = vsel %vm568_vm1, %v1142_v37, 0.0 }
 0x13d   : > { %1143 = vpow2.f32 %v587_v38  ;;  %594 = vadd.xlane.f32.xlu2 %v593_v40 }
 0x13e   : > { %1145 = vpow2.f32 %v589_v39 }
 0x140   : > { %v580_v41 = vpop.xlane.xlu1 %579 }
 0x141   : > { %v584_v42 = vsub.f32 %v566_v28, %v580_v41  ;;  %v666_v28 = vld [vmem:[%s1568_s18 + $0x8] sm:$0xff] }
 0x143   : > { %v1551_v43 = vpop.eup %1143  ;;  %v591_v44 = vmul.f32 1.442695, %v584_v42 }
 0x144   : > { %v1553_v45 = vpop.eup %1145  ;;  %v596_v46 = vsel %vm568_vm1, %v1551_v43, 0.0 }
 0x145   : > { %1147 = vpow2.f32 %v591_v44  ;;  %597 = vadd.xlane.f32.xlu0 %v596_v46  ;;  %v599_v47 = vsel %vm568_vm1, %v1553_v45, 0.0 }
 0x146   : > { %600 = vadd.xlane.f32.xlu2 %v599_v47 }
 0x14b   : > { %v1559_v48 = vpop.eup %1147 }
 0x14c   : > { %v602_v49 = vsel %vm568_vm1, %v1559_v48, 0.0 }
 0x14d   : > { %603 = vadd.xlane.f32.xlu1 %v602_v49 }
 0x1b0   : > { %v595_v54 = vpop.xlane.xlu2 %594 }
 0x1b1   : > { %1149 = vrcp.f32 %v595_v54  ;;  %v616_v61 = vand.u32 2147483648, %v595_v54  ;;  %v614_v62 = vand.u32 2147483647, %v595_v54  ;;  %vm610_vm3 = vweird.f32 %v595_v54 }
 0x1b3   : > { %v617_v2 = vor.u32 1.1754944e-38, %v616_v61  ;;  %vm615_vm5 = vcmp.eq.f32.partialorder %v614_v62, 8.507059e+37 }
 0x1b7   : > { %v1150_v55 = vpop.eup %1149 }
 0x1b8   : > { %v606_v56 = vmul.f32 %v1150_v55, %v595_v54  ;;  %v598_v57 = vpop.xlane.xlu0 %597  ;;  %vm611_vm2 = vweird.f32 %v1150_v55 }
 0x1b9   : > { %v601_v58 = vpop.xlane.xlu2 %600  ;;  %1151 = vrcp.f32 %v598_v57  ;;  %vm612_vm4 = vmor %vm610_vm3, %vm611_vm2  ;;  %v630_v11 = vand.u32 2147483648, %v598_v57  ;;  %v628_v15 = vand.u32 2147483647, %v598_v57  ;;  %vm624_vm8 = vweird.f32 %v598_v57 }
 0x1ba   : > { %v607_v59 = vsub.f32 1.0, %v606_v56  ;;  %1153 = vrcp.f32 %v601_v58  ;;  %v644_v13 = vand.u32 2147483648, %v601_v58  ;;  %v642_v17 = vand.u32 2147483647, %v601_v58 }
 0x1bb   : > { %vm638_vm9 = vweird.f32 %v601_v58  ;;  %v631_v22 = vor.u32 1.1754944e-38, %v630_v11  ;;  %vm629_vm12 = vcmp.eq.f32.partialorder %v628_v15, 8.507059e+37 }
 0x1bc   : > { %v608_v60 = vmul.f32 %v1150_v55, %v607_v59  ;;  %v645_v23 = vor.u32 1.1754944e-38, %v644_v13  ;;  %vm643_vm13 = vcmp.eq.f32.partialorder %v642_v17, 8.507059e+37 }
 0x1be   : > { %v609_v63 = vadd.f32 %v1150_v55, %v608_v60 }
 0x1bf   : > { %v1152_v0 = vpop.eup %1151 }
 0x1c0   : > { %v1154_v1 = vpop.eup %1153  ;;  %v620_v3 = vmul.f32 %v1152_v0, %v598_v57  ;;  %v604_v4 = vpop.xlane.xlu1 %603  ;;  %v613_v5 = vsel %vm612_vm4, %v1150_v55, %v609_v63  ;;  %vm625_vm6 = vweird.f32 %v1152_v0 }
 0x1c1   : > { %v634_v6 = vmul.f32 %v1154_v1, %v601_v58  ;;  %1155 = vrcp.f32 %v604_v4  ;;  %v618_v8 = vsel %vm615_vm5, %v617_v2, %v613_v5  ;;  %vm639_vm7 = vweird.f32 %v1154_v1  ;;  %vm626_vm10 = vmor %vm624_vm8, %vm625_vm6 }
 0x1c2   : > { %v621_v7 = vsub.f32 1.0, %v620_v3  ;;  %v661_v12 = vmul.f32 %v1142_v37, %v618_v8  ;;  %vm640_vm11 = vmor %vm638_vm9, %vm639_vm7  ;;  %v658_v33 = vand.u32 2147483648, %v604_v4  ;;  %v656_v36 = vand.u32 2147483647, %v604_v4 }
 0x1c3   : > { %v635_v10 = vsub.f32 1.0, %v634_v6  ;;  %vm652_vm15 = vweird.f32 %v604_v4 }
 0x1c4   : > { %v622_v14 = vmul.f32 %v1152_v0, %v621_v7  ;;  %v669_v18 = vmul.f32 %v665_v9, %v661_v12  ;;  %v659_v40 = vor.u32 1.1754944e-38, %v658_v33  ;;  %vm657_vm3 = vcmp.eq.f32.partialorder %v656_v36, 8.507059e+37 }
 0x1c5   : > { %v636_v16 = vmul.f32 %v1154_v1, %v635_v10 }
 0x1c6   : > { %v623_v19 = vadd.f32 %v1152_v0, %v622_v14  ;;  %673 = vst.msk [vmem:[%s1572_s19] sm:$0xff] %vm568_vm1, %v669_v18  ;;  %1025 = vmatmul.msk.f32.vlgmr.msra.gmra.mxu2 %vm568_vm1, %v669_v18 }
 0x1c7   : > { %v1156_v20 = vpop.eup %1155  ;;  %v637_v21 = vadd.f32 %v1154_v1, %v636_v16 }
 0x1c8   : > { %v627_v24 = vsel %vm626_vm10, %v1152_v0, %v623_v19  ;;  %v648_v25 = vmul.f32 %v1156_v20, %v604_v4  ;;  %vm653_vm14 = vweird.f32 %v1156_v20 }
 0x1c9   : > { %v641_v26 = vsel %vm640_vm11, %v1154_v1, %v637_v21  ;;  %v632_v27 = vsel %vm629_vm12, %v631_v22, %v627_v24  ;;  %vm654_vm2 = vmor %vm652_vm15, %vm653_vm14 }
 0x1ca   : > { %v649_v29 = vsub.f32 1.0, %v648_v25  ;;  %v662_v30 = vmul.f32 %v1551_v43, %v632_v27  ;;  %v646_v31 = vsel %vm643_vm13, %v645_v23, %v641_v26  ;;  %v668_v43 = vld [vmem:[%s1568_s18 + $0x18] sm:$0xff] }
 0x1cb   : > { %v663_v34 = vmul.f32 %v1553_v45, %v646_v31 }
 0x1cc   : > { %v650_v35 = vmul.f32 %v1156_v20, %v649_v29  ;;  %v670_v37 = vmul.f32 %v666_v28, %v662_v30 }
 0x1cd   : > { %v671_v38 = vmul.f32 %v667_v32, %v663_v34 }
 0x1ce   : > { %v651_v39 = vadd.f32 %v1156_v20, %v650_v35  ;;  %674 = vst.msk [vmem:[%s1572_s19 + $0x8] sm:$0xff] %vm568_vm1, %v670_v37  ;;  %1026 = vmatmul.msk.f32.gmra.mxu2 %vm568_vm1, %v670_v37 }
 0x1cf   : > { %675 = vst.msk [vmem:[%s1572_s19 + $0x10] sm:$0xff] %vm568_vm1, %v671_v38  ;;  %1027 = vmatmul.msk.f32.vlgmr.msra.gmra.mxu3 %vm568_vm1, %v671_v38 }
 0x1d0   : > { %v655_v41 = vsel %vm654_vm2, %v1156_v20, %v651_v39 }
 0x1d1   : > { %v660_v42 = vsel %vm657_vm3, %v659_v40, %v655_v41 }
 0x1d2   : > { %v664_v44 = vmul.f32 %v1559_v48, %v660_v42 }
 0x1d4   : > { %v672_v45 = vmul.f32 %v668_v43, %v664_v44 }
 0x1d6   : > { %676 = vst.msk [vmem:[%s1572_s19 + $0x18] sm:$0xff] %vm568_vm1, %v672_v45 }
 0x1d7   : > { %1028 = vmatmul.msk.f32.gmra.mxu3 %vm568_vm1, %v672_v45 }
 0x1d8   : > { %1274 = shalt.err (!%p1271_p0)
}
 0x1d9   : > { %s1369_s14 = smov 128   ;;  %s1370_s15 = smov 8  }
 0x1da   : > { %1067 = dma.vmem_to_hbm [thread:$0]  (%p1461_p9), %s785_s30, 512, %s787_s13, %s749_s26, %s1369_s14, %s1369_s14, %s1370_s15  }
 0x1db   : > { %s437_s27 = scalar_lea.vmem [#allocation8], %s1515_s23  ;;  %s1687_s7 = sld [smem:[#allocation23_spill]] }
 0x1dc   : > { %s764_s19 = sshll.u32 %s437_s27, 4  ;;  %s744_s23 = scalar_lea.sflag [#allocation4], %s1512_s2  ;;  %s765_s19 = int_to_ptr.vmem [resolvable:$true] %s764_s19 }
 0x1e1   : > { %s763_s18 = scalar_lea.hbm %s1687_s7, %s1048_s20  ;;  %s1295_s20 = scalar_lea.hbm %s1687_s7, 64 }
 0x1e2   : > { %s766_s17 = sshll.u32 %s763_s18, 4  ;;  %s767_s17 = int_to_ptr.hbm [resolvable:$true] %s766_s17 }
 0x1e3   : > { %s1289_s30 = sshra.s32 %s767_s17, 4  ;;  %s1290_s30 = int_to_ptr.hbm [resolvable:$true] %s1289_s30 }
 0x1e4   : > { %s1291_s28 = scalar_lea.hbm %s1290_s30, 32  ;;  %p1296_p4 = scmp.lt.s32.totalorder %s1290_s30, %s1687_s7 }
 0x1e5   : > { %p1292_p1 = scmp.ne.s32.totalorder %s1290_s30, %s1291_s28  ;;  %p1297_p5 = scmp.lt.s32.totalorder %s1295_s20, %s1291_s28 }
 0x1e7   : > { %p1293_p2 = pnand %p1292_p1, %p1461_p9  ;;  %p1298_p6 = por %p1297_p5, %p1296_p4 }
 0x1e9   : > { %p1294_p3 = pneg %p1293_p2 }
 0x1eb   : > { %p1299_p7 = pnand %p1298_p6, %p1294_p3 }
 0x249   : > { %v704_v46 = vpop.f32.mrf.mxu2 }
 0x24a   : > { %739 = vst.msk [vmem:[%s437_s27] sm:$0xff] %vm497_vm0, %v704_v46 }
 0x251   : > { %v707_v47 = vpop.f32.mrf.mxu2 }
 0x252   : > { %v733_v48 = vpop.f32.mrf.mxu3  ;;  %740 = vst.msk [vmem:[%s437_s27 + $0x8] sm:$0xff] %vm497_vm0, %v707_v47 }
 0x253   : > { %741 = vst.msk [vmem:[%s437_s27 + $0x10] sm:$0xff] %vm497_vm0, %v733_v48 }
 0x25a   : > { %v736_v49 = vpop.f32.mrf.mxu3 }
 0x25b   : > { %742 = vst.msk [vmem:[%s437_s27 + $0x18] sm:$0xff] %vm497_vm0, %v736_v49 }
 0x25c   : > { %1302 = shalt.err (!%p1299_p7)
}
 0x25d   : > { %1066 = dma.vmem_to_hbm [thread:$0]  (%p1461_p9), %s765_s19, 512, %s767_s17, %s744_s23, %s1369_s14, %s1369_s14, %s1370_s15  }
 0x25e PF: > { %s1688_s2 = sld [smem:[#allocation15_spill]]  ;;  %p1081_p8 = pnand %p992_p12, %p1468_p11 }
 0x25f   : > { %s1690_s25 = sld [smem:[#allocation18_spill]] }
 0x260   : > { %p1082_p10 = pneg %p1081_p8 }
 0x264   : > { %s801_s29 = sand.u32 1, %s1688_s2  }
 0x265   : > { %s802_s24 = scalar_lea.sflag [#allocation4], %s801_s29 }
 0x266   : > { %1336 = dma.done.wait (%p1082_p10), %s802_s24, 512  }
 0x267   : > { %1338 = vsyncadd (%p1082_p10), %s802_s24, 4294966784  ;;  %s812_s11 = scalar_lea.sflag [#allocation10], %s801_s29 }
 0x268   : > { %1340 = dma.done.wait (%p1082_p10), %s812_s11, 512  }
 0x269   : > { %1342 = vsyncadd (%p1082_p10), %s812_s11, 4294966784  ;;  %s29_s26 = sadd.s32 1, %s1690_s25   ;;  %s1691_s10 = sld [smem:[#allocation16_spill]] }
 0x26a   : > { %p26_p13 = scmp.ge.s32.totalorder %s29_s26, 4   ;;  %s1692_s23 = sld [smem:[#allocation20_spill]] }
 0x26b   : > { %s1693_s24 = sld [smem:[#allocation17_spill]]  ;;  %s1695_s21 = smov %s1349_s22 }
 0x26c   : > { %s1694_s25 = sld [smem:[#allocation19_spill]]  ;;  %28 = sbr.rel (!%p26_p13) target bundleno = 13 (0xd), region = 132 }
 0x26f   : > { %s1696_s22 = smov %s1691_s10 }
 0x271   :  { %818 = vsyncpa [#allocation3], 1 }
 0x272   :  { %820 = vsyncpa [#allocation3 + $0x1], 1 }
 0x273   :  { %821 = vsyncpa [#allocation6], 1 }
 0x274   :  { %823 = vsyncpa [#allocation6 + $0x1], 1 }
 0x275   :  { %824 = vsyncpa [#allocation4], 1 }
 0x276   :  { %826 = vsyncpa [#allocation4 + $0x1], 1 }
 0x277   :  { %827 = vsyncpa [#allocation10], 1 }
 0x278   :  { %829 = vsyncpa [#allocation10 + $0x1], 1 }

</bundles_post_ra>
